<compile_context>
chip_gen: v6e
topology: v6e:2x2x1
jax: 0.10.0
libtpu: 0.0.40
codegen_flags: <defaults>
</compile_context>

<pallas_src>
import functools

import jax
import jax.numpy as jnp
from jax.experimental import pallas as pl
from jax.experimental.pallas import tpu as pltpu


def mlp_kernel(x_ref, w1_ref, b1_ref, w2_ref, b2_ref, w3_ref, b3_ref, o_ref):
    # x_ref:  [F, TB]   (compute dtype, batch on lanes)
    # w1_ref: [H1, F]   w2_ref: [H2, H1]   (compute dtype, PyTorch [out,in] layout)
    # b1_ref: [H1, 1]   b2_ref: [H2, 1]    w3_ref: [H2, 1]   b3_ref: [1, 1]   (f32)
    # o_ref:  [1, TB]   (f32, lane-dense)
    f_dim = x_ref.shape[0]

    # ---- Layer 1 on the VPU --------------------------------------------------
    # K=3 contraction as unrolled broadcast MACs: w1[:, f] (lane-broadcast) times
    # x[f, :] (sublane-broadcast), bias folded into the first term.  Math in f32
    # (v5e VPU has no bf16); ~6 VALU ops per output vreg, hides under layer-2 MXU.
    xf = x_ref[...].astype(jnp.float32)             # [F, TB]
    w1 = w1_ref[...].astype(jnp.float32)            # [H1, F]
    h1 = w1[:, 0:1] * xf[0:1, :] + b1_ref[...]      # [H1, TB]
    for f in range(1, f_dim):                       # static F, fully unrolled
        h1 = h1 + w1[:, f:f + 1] * xf[f:f + 1, :]
    # Fused ReLU + downcast: produce the layer-2 MXU operand directly in the
    # compute dtype (single full-width copy of h1 through VMEM).
    h1c = jnp.maximum(h1, 0.0).astype(w2_ref.dtype)

    # ---- Layer 2 on the MXU --------------------------------------------------
    # [H2, H1] x [H1, TB] -- batch fills the MXU N dimension, f32 accumulation.
    h2 = jnp.dot(w2_ref[...], h1c, preferred_element_type=jnp.float32)
    h2 = jnp.maximum(h2 + b2_ref[...], 0.0)         # [H2, TB] f32

    # ---- Output layer (out_features == 1) on the VPU/XLU ----------------------
    # Broadcast multiply (VALU) + cross-sublane reduce (XLU); frees the MXU.
    out = jnp.sum(h2 * w3_ref[...], axis=0, keepdims=True)   # [1, TB]
    o_ref[...] = (out + b3_ref[...]).astype(o_ref.dtype)


@functools.partial(jax.jit, static_argnames=("block_b", "compute_dtype"))
def regularized_regression_forward(x, w1, b1, w2, b2, w3, b3,
                                   *, block_b=8192, compute_dtype=jnp.bfloat16):
    """Forward pass. Params are in PyTorch layout: w [out, in], b [out]."""
    B, F = x.shape
    H1 = w1.shape[0]
    H2 = w2.shape[0]
    out_size = w3.shape[0]
    # The VPU final-layer path assumes a single output unit (module default).
    # TODO(synk): for output_size > 1 route the last layer back through the MXU.
    assert out_size == 1, "kernel specialized for output_size == 1"

    cdt = jnp.dtype(compute_dtype)

    # Layout plumbing (cheap wrapper-side ops).  Cast *before* the transpose so
    # the strided [B,3]->[3,B] copy moves the narrow dtype.  Note: in the bf16
    # path this also reduces input precision to bf16 (fine at module accuracy;
    # pass compute_dtype=jnp.float32 for an exact path).
    x_t = x.astype(cdt).T                            # [F, B]
    w1c = w1.astype(cdt)                             # [H1, F]
    w2c = w2.astype(cdt)                             # [H2, H1]
    w3c = w3.T.astype(jnp.float32)                   # [H2, 1]
    b1c = b1.reshape(-1, 1).astype(jnp.float32)      # [H1, 1]
    b2c = b2.reshape(-1, 1).astype(jnp.float32)      # [H2, 1]
    b3c = b3.reshape(1, 1).astype(jnp.float32)       # [1, 1]

    # Batch tile: full batch if it fits in one tile (block == full dim is always
    # legal), otherwise a lane-aligned multiple of 128.  TB=8192 keeps per-tile
    # VMEM ~9 MB (h1/h2 intermediates dominate) -- inside every generation's
    # default scoped-VMEM limit -- and amortizes the ~0.35us per-grid-step cost.
    # If you push block_b past ~16K, set vmem_limit_bytes explicitly (esp. v7x).
    tb = min(block_b, B)
    if B > tb:
        tb = max(128, (tb // 128) * 128)
    grid = (pl.cdiv(B, tb),)

    out_t = pl.pallas_call(
        mlp_kernel,
        out_shape=jax.ShapeDtypeStruct((out_size, B), jnp.float32),
        grid=grid,
        in_specs=[
            pl.BlockSpec((F, tb), lambda i: (0, i)),      # x: streamed batch tiles
            # Weights/biases: constant index_map -> DMA'd once, VMEM-resident
            # (~50 KB total incl. the default double buffer; negligible).
            pl.BlockSpec((H1, F), lambda i: (0, 0)),
            pl.BlockSpec((H1, 1), lambda i: (0, 0)),
            pl.BlockSpec((H2, H1), lambda i: (0, 0)),
            pl.BlockSpec((H2, 1), lambda i: (0, 0)),
            pl.BlockSpec((H2, 1), lambda i: (0, 0)),
            pl.BlockSpec((1, 1), lambda i: (0, 0)),
        ],
        out_specs=pl.BlockSpec((out_size, tb), lambda i: (0, i)),
        compiler_params=pltpu.CompilerParams(
            # Batch tiles are independent -> megacore sharding on v7x (no-op on
            # v5e/v6e).  TODO(synk): if an xprof on v7x shows one TensorCore
            # idle, switch this axis to pltpu.CORE_PARALLEL.
            dimension_semantics=("parallel",),
        ),
    )(x_t, w1c, b1c, w2c, b2c, w3c, b3c)

    return out_t.T                                        # [B, 1] f32


def init_params(key, input_size=3, hidden_sizes=(128, 64), output_size=1):
    """nn.Linear-style init: U(-1/sqrt(fan_in), 1/sqrt(fan_in)).

    Returns params in PyTorch layout: weights [out, in], biases [out].
    """
    sizes = [input_size] + list(hidden_sizes) + [output_size]
    params = []
    for i in range(len(sizes) - 1):
        fan_in, fan_out = sizes[i], sizes[i + 1]
        key, kw, kb = jax.random.split(key, 3)
        bound = 1.0 / (fan_in ** 0.5)
        w = jax.random.uniform(kw, (fan_out, fan_in), jnp.float32, -bound, bound)
        b = jax.random.uniform(kb, (fan_out,), jnp.float32, -bound, bound)
        params += [w, b]
    return params


def reference_forward(x, w1, b1, w2, b2, w3, b3):
    h1 = jnp.maximum(x @ w1.T + b1, 0.0)
    h2 = jnp.maximum(h1 @ w2.T + b2, 0.0)
    return h2 @ w3.T + b3


if __name__ == "__main__":
    key = jax.random.PRNGKey(0)
    k_x, k_p, k_x2 = jax.random.split(key, 3)

    input_size = 3
    w1, b1, w2, b2, w3, b3 = init_params(
        k_p, input_size=input_size, hidden_sizes=(128, 64), output_size=1
    )

    # Small batch (module-typical usage).
    batch = 8
    x = jax.random.normal(k_x, (batch, input_size), dtype=jnp.float32)
    ref = reference_forward(x, w1, b1, w2, b2, w3, b3)

    # Exact f32 path.
    out_f32 = regularized_regression_forward(
        x, w1, b1, w2, b2, w3, b3, compute_dtype=jnp.float32)
    out_f32 = jax.block_until_ready(out_f32)
    assert out_f32.shape == (batch, 1), out_f32.shape
    assert jnp.allclose(out_f32, ref, atol=1e-5, rtol=1e-5), "f32 mismatch vs reference"

    # Default bf16-MXU / f32-accumulate path.
    out_bf16 = regularized_regression_forward(x, w1, b1, w2, b2, w3, b3)
    out_bf16 = jax.block_until_ready(out_bf16)
    assert out_bf16.shape == (batch, 1), out_bf16.shape
    assert jnp.allclose(out_bf16, ref, atol=5e-2, rtol=5e-2), "bf16 mismatch vs reference"

    # Multi-tile batch grid with a ragged last tile (exercises the streamed
    # lane-dense output path and masked edge writeback).
    x2 = jax.random.normal(k_x2, (300, input_size), dtype=jnp.float32)
    ref2 = reference_forward(x2, w1, b1, w2, b2, w3, b3)
    out2 = regularized_regression_forward(
        x2, w1, b1, w2, b2, w3, b3, block_b=128, compute_dtype=jnp.float32)
    out2 = jax.block_until_ready(out2)
    assert out2.shape == (300, 1), out2.shape
    assert jnp.allclose(out2, ref2, atol=1e-5, rtol=1e-5), "tiled mismatch vs reference"

    print("KERNEL_OK")
</pallas_src>

<mosaic_0001>
module attributes {stable_mosaic.version = 11 : i64} {
  func.func @mlp_kernel(%arg0: i32, %arg1: memref<3x8xf32, #tpu.memory_space<vmem>>, %arg2: memref<128x3xf32, #tpu.memory_space<vmem>>, %arg3: memref<128x1xf32, #tpu.memory_space<vmem>>, %arg4: memref<64x128xf32, #tpu.memory_space<vmem>>, %arg5: memref<64x1xf32, #tpu.memory_space<vmem>>, %arg6: memref<64x1xf32, #tpu.memory_space<vmem>>, %arg7: memref<1x1xf32, #tpu.memory_space<vmem>>, %arg8: memref<1x8xf32, #tpu.memory_space<vmem>>) attributes {dimension_semantics = [#tpu.dimension_semantics<parallel>], iteration_bounds = array<i64: 1>, scalar_prefetch = 0 : i64, scratch_operands = 0 : i64, tpu.core_type = #tpu.core_type<tc>, window_params = [{transform_indices = @transform_0, window_bounds = array<i64: 3, 8>}, {pipeline_mode = #tpu.pipeline_mode<synchronous>, transform_indices = @transform_1, window_bounds = array<i64: 128, 3>}, {pipeline_mode = #tpu.pipeline_mode<synchronous>, transform_indices = @transform_2, window_bounds = array<i64: 128, 1>}, {pipeline_mode = #tpu.pipeline_mode<synchronous>, transform_indices = @transform_3, window_bounds = array<i64: 64, 128>}, {pipeline_mode = #tpu.pipeline_mode<synchronous>, transform_indices = @transform_4, window_bounds = array<i64: 64, 1>}, {pipeline_mode = #tpu.pipeline_mode<synchronous>, transform_indices = @transform_5, window_bounds = array<i64: 64, 1>}, {pipeline_mode = #tpu.pipeline_mode<synchronous>, transform_indices = @transform_6, window_bounds = array<i64: 1, 1>}, {transform_indices = @transform_7, window_bounds = array<i64: 1, 8>}]} {
    %c0 = arith.constant 0 : index
    %c0_0 = arith.constant 0 : index
    %0 = vector.load %arg1[%c0, %c0_0] : memref<3x8xf32, #tpu.memory_space<vmem>>, vector<3x8xf32>
    %c0_1 = arith.constant 0 : index
    %c0_2 = arith.constant 0 : index
    %1 = vector.load %arg2[%c0_1, %c0_2] : memref<128x3xf32, #tpu.memory_space<vmem>>, vector<128x3xf32>
    %2 = vector.extract_strided_slice %1 {offsets = [0, 0], sizes = [128, 1], strides = [1, 1]} : vector<128x3xf32> to vector<128x1xf32>
    %3 = vector.extract_strided_slice %0 {offsets = [0, 0], sizes = [1, 8], strides = [1, 1]} : vector<3x8xf32> to vector<1x8xf32>
    %4 = vector.broadcast %2 : vector<128x1xf32> to vector<128x8xf32>
    %5 = vector.broadcast %3 : vector<1x8xf32> to vector<128x8xf32>
    %6 = arith.mulf %4, %5 : vector<128x8xf32>
    %c0_3 = arith.constant 0 : index
    %c0_4 = arith.constant 0 : index
    %7 = vector.load %arg3[%c0_3, %c0_4] : memref<128x1xf32, #tpu.memory_space<vmem>>, vector<128x1xf32>
    %8 = vector.broadcast %7 : vector<128x1xf32> to vector<128x8xf32>
    %9 = arith.addf %6, %8 : vector<128x8xf32>
    %10 = vector.extract_strided_slice %1 {offsets = [0, 1], sizes = [128, 1], strides = [1, 1]} : vector<128x3xf32> to vector<128x1xf32>
    %11 = vector.extract_strided_slice %0 {offsets = [1, 0], sizes = [1, 8], strides = [1, 1]} : vector<3x8xf32> to vector<1x8xf32>
    %12 = vector.broadcast %10 : vector<128x1xf32> to vector<128x8xf32>
    %13 = vector.broadcast %11 : vector<1x8xf32> to vector<128x8xf32>
    %14 = arith.mulf %12, %13 : vector<128x8xf32>
    %15 = arith.addf %9, %14 : vector<128x8xf32>
    %16 = vector.extract_strided_slice %1 {offsets = [0, 2], sizes = [128, 1], strides = [1, 1]} : vector<128x3xf32> to vector<128x1xf32>
    %17 = vector.extract_strided_slice %0 {offsets = [2, 0], sizes = [1, 8], strides = [1, 1]} : vector<3x8xf32> to vector<1x8xf32>
    %18 = vector.broadcast %16 : vector<128x1xf32> to vector<128x8xf32>
    %19 = vector.broadcast %17 : vector<1x8xf32> to vector<128x8xf32>
    %20 = arith.mulf %18, %19 : vector<128x8xf32>
    %21 = arith.addf %15, %20 : vector<128x8xf32>
    %cst = arith.constant 0.000000e+00 : f32
    %22 = vector.broadcast %cst : f32 to vector<128x8xf32>
    %23 = arith.maximumf %21, %22 : vector<128x8xf32>
    %c0_5 = arith.constant 0 : index
    %c0_6 = arith.constant 0 : index
    %24 = vector.load %arg4[%c0_5, %c0_6] : memref<64x128xf32, #tpu.memory_space<vmem>>, vector<64x128xf32>
    %cst_7 = arith.constant dense<0.000000e+00> : vector<64x8xf32>
    %25 = tpu.matmul %24, %23, %cst_7 {dimension_numbers = #tpu.dot_dimension_numbers<[1], [0], [0], [1], [0, 0, 1, 1], [], []>} : vector<64x128xf32>, vector<128x8xf32>, vector<64x8xf32> -> vector<64x8xf32>
    %c0_8 = arith.constant 0 : index
    %c0_9 = arith.constant 0 : index
    %26 = vector.load %arg5[%c0_8, %c0_9] : memref<64x1xf32, #tpu.memory_space<vmem>>, vector<64x1xf32>
    %27 = vector.broadcast %26 : vector<64x1xf32> to vector<64x8xf32>
    %28 = arith.addf %25, %27 : vector<64x8xf32>
    %cst_10 = arith.constant 0.000000e+00 : f32
    %29 = vector.broadcast %cst_10 : f32 to vector<64x8xf32>
    %30 = arith.maximumf %28, %29 : vector<64x8xf32>
    %c0_11 = arith.constant 0 : index
    %c0_12 = arith.constant 0 : index
    %31 = vector.load %arg6[%c0_11, %c0_12] : memref<64x1xf32, #tpu.memory_space<vmem>>, vector<64x1xf32>
    %32 = vector.broadcast %31 : vector<64x1xf32> to vector<64x8xf32>
    %33 = arith.mulf %30, %32 : vector<64x8xf32>
    %cst_13 = arith.constant dense<0.000000e+00> : vector<8xf32>
    %34 = vector.multi_reduction <add>, %33, %cst_13 [0] : vector<64x8xf32> to vector<8xf32>
    %35 = vector.shape_cast %34 : vector<8xf32> to vector<1x8xf32>
    %c0_14 = arith.constant 0 : index
    %c0_15 = arith.constant 0 : index
    %36 = vector.load %arg7[%c0_14, %c0_15] : memref<1x1xf32, #tpu.memory_space<vmem>>, vector<1x1xf32>
    %37 = vector.broadcast %36 : vector<1x1xf32> to vector<1x8xf32>
    %38 = arith.addf %35, %37 : vector<1x8xf32>
    %c0_16 = arith.constant 0 : index
    %c0_17 = arith.constant 0 : index
    %39 = vector.load %arg8[%c0_16, %c0_17] : memref<1x8xf32, #tpu.memory_space<vmem>>, vector<1x8xf32>
    tpu.vector_store %arg8[%c0_16, %c0_17], %38 {strides = array<i32>} : memref<1x8xf32, #tpu.memory_space<vmem>>, vector<1x8xf32>,
    return
  }
  func.func @transform_0(%arg0: i32) -> (i32, i32) {
    %c0_i32 = arith.constant 0 : i32
    %c0_i32_0 = arith.constant 0 : i32
    return %c0_i32, %arg0 : i32, i32
  }
  func.func @transform_1(%arg0: i32) -> (i32, i32) {
    %c0_i32 = arith.constant 0 : i32
    %c0_i32_0 = arith.constant 0 : i32
    %c0_i32_1 = arith.constant 0 : i32
    return %c0_i32, %c0_i32_0 : i32, i32
  }
  func.func @transform_2(%arg0: i32) -> (i32, i32) {
    %c0_i32 = arith.constant 0 : i32
    %c0_i32_0 = arith.constant 0 : i32
    %c0_i32_1 = arith.constant 0 : i32
    return %c0_i32, %c0_i32_0 : i32, i32
  }
  func.func @transform_3(%arg0: i32) -> (i32, i32) {
    %c0_i32 = arith.constant 0 : i32
    %c0_i32_0 = arith.constant 0 : i32
    %c0_i32_1 = arith.constant 0 : i32
    return %c0_i32, %c0_i32_0 : i32, i32
  }
  func.func @transform_4(%arg0: i32) -> (i32, i32) {
    %c0_i32 = arith.constant 0 : i32
    %c0_i32_0 = arith.constant 0 : i32
    %c0_i32_1 = arith.constant 0 : i32
    return %c0_i32, %c0_i32_0 : i32, i32
  }
  func.func @transform_5(%arg0: i32) -> (i32, i32) {
    %c0_i32 = arith.constant 0 : i32
    %c0_i32_0 = arith.constant 0 : i32
    %c0_i32_1 = arith.constant 0 : i32
    return %c0_i32, %c0_i32_0 : i32, i32
  }
  func.func @transform_6(%arg0: i32) -> (i32, i32) {
    %c0_i32 = arith.constant 0 : i32
    %c0_i32_0 = arith.constant 0 : i32
    %c0_i32_1 = arith.constant 0 : i32
    return %c0_i32, %c0_i32_0 : i32, i32
  }
  func.func @transform_7(%arg0: i32) -> (i32, i32) {
    %c0_i32 = arith.constant 0 : i32
    %c0_i32_0 = arith.constant 0 : i32
    return %c0_i32, %arg0 : i32, i32
  }
}

</mosaic_0001>

<bundles_post_ra>
// kernel: regularized_regression_forward.1
= control target key start
LH: loop header
LB: loop body
LE: loop exit
PB: predicated region body
PF: predicated region fallthrough
CT: control target
= control target key end

     0   :  { %s1310_s0 = inlined_call_operand.vmem [shape: f32[3,8], index: 0, kind: input, shape index: {}]   ;;  %s1311_s1 = inlined_call_operand.vmem [shape: f32[128,3], index: 1, kind: input, shape index: {}]   ;;  %s1312_s2 = inlined_call_operand.vmem [shape: f32[128,1], index: 2, kind: input, shape index: {}]   ;;  %s1313_s3 = inlined_call_operand.vmem [shape: f32[64,128], index: 3, kind: input, shape index: {}]   ;;  %s1314_s4 = inlined_call_operand.vmem [shape: f32[64,1], index: 4, kind: input, shape index: {}]   ;;  %s1315_s5 = inlined_call_operand.vmem [shape: f32[64,1], index: 5, kind: input, shape index: {}]   ;;  %s1316_s6 = inlined_call_operand.<no memory space> [shape: f32[1,1], index: 6, kind: input, shape index: {}]   ;;  %s1317_s7 = inlined_call_operand.hbm [shape: f32[1,8], index: 7, kind: output, shape index: {}]  }
   0x1   :  { %v12_v0 = vstv %s1316_s6 }
   0x2   :  { %13 = vst [vmem:[#allocation2] sm:$0x1] %v12_v0 }
   0x3   :  { %v161_v1 = vld [vmem:[%s1312_s2 + $0x78] sm:$0xff]  ;;  %v44_v2 = vld [vmem:[%s1311_s1 + $0x70] sm:$0xff]  ;;  %v918_v3 = vmov 1   ;;  %v919_v4 = vmov 0   ;;  %v42_v5 = vld [vmem:[%s1311_s1 + $0x60] sm:$0xff] }
   0x4   :  { %855 = vset.pattern.permute.xlu0 %v918_v3  ;;  %852 = vset.pattern.permute.xlu1 %v919_v4  ;;  %v45_v6 = vld [vmem:[%s1311_s1 + $0x78] sm:$0xff]  ;;  %v983_v7 = vld [vmem:[%s1311_s1 + $0x50] sm:$0xff] }
   0x5   :  { %239 = vperm.xlu1 %852, %v161_v1   ;;  %315 = vperm.xlu0 %855, %v44_v2   ;;  %v160_v8 = vld [vmem:[%s1312_s2 + $0x70] sm:$0xff] }
   0x9   :  { %853 = vset.pattern.permute.xlu1 %v918_v3  ;;  %307 = vperm.xlu0 %855, %v42_v5  }
   0xa   :  { %319 = vperm.xlu1 %853, %v45_v6  }
   0xd   :  { %299 = vperm.xlu0 %855, %v983_v7  }
   0xe   :  { %14 = vsyncpa [#allocation4], 0  ;;  %854 = vset.pattern.permute.xlu1 %v919_v4  ;;  %v993_v9 = vld [vmem:[%s1311_s1 + $0x40] sm:$0xff]  ;;  %v999_v10 = vld [vmem:[%s1311_s1 + $0x30] sm:$0xff]  ;;  %v920_v11 = vmov 2   ;;  %v126_v42 = vlaneseq  ;;  %vm699_vm0 = vcmask 64512  }
   0xf   :  { %234 = vperm.xlu1 %854, %v160_v8   ;;  %v1006_v12 = vld [vmem:[%s1311_s1 + $0x20] sm:$0xff]  ;;  %v1013_v13 = vld [vmem:[%s1311_s1 + $0x10] sm:$0xff]  ;;  %v43_v14 = vld [vmem:[%s1311_s1 + $0x68] sm:$0xff]  ;;  %vm732_vm1 = vcmask 57344  }
  0x10   :  { %v158_v15 = vld [vmem:[%s1312_s2 + $0x60] sm:$0xff]  ;;  %v159_v16 = vld [vmem:[%s1312_s2 + $0x68] sm:$0xff]  ;;  %v41_v17 = vld [vmem:[%s1311_s1 + $0x58] sm:$0xff]  ;;  %v1125_v44 = vshrl.u32 %v126_v42, 7 }
  0x11   :  { %291 = vperm.xlu0 %855, %v993_v9   ;;  %v157_v18 = vld [vmem:[%s1312_s2 + $0x58] sm:$0xff]  ;;  %v39_v19 = vld [vmem:[%s1311_s1 + $0x48] sm:$0xff]  ;;  %v156_v21 = vld [vmem:[%s1312_s2 + $0x50] sm:$0xff] }
  0x12   :  { %v155_v20 = vld [vmem:[%s1312_s2 + $0x48] sm:$0xff]  ;;  %v37_v22 = vld [vmem:[%s1311_s1 + $0x38] sm:$0xff]  ;;  %v154_v28 = vld [vmem:[%s1312_s2 + $0x40] sm:$0xff]  ;;  %v324_v47 = vsub.s32 1, %v1125_v44  ;;  %v128_v48 = vsub.s32 0, %v1125_v44  ;;  %v424_v52 = vsub.s32 2, %v1125_v44 }
  0x13   :  { %856 = vset.pattern.permute.xlu1 %v920_v11  ;;  %v153_v23 = vld [vmem:[%s1312_s2 + $0x38] sm:$0xff]  ;;  %v35_v24 = vld [vmem:[%s1311_s1 + $0x28] sm:$0xff]  ;;  %v146_v31 = vld [vmem:[%s1312_s2] sm:$0xff] }
  0x14   :  { %419 = vperm.xlu1 %856, %v45_v6   ;;  %v151_v25 = vld [vmem:[%s1312_s2 + $0x28] sm:$0xff]  ;;  %v1069_v26 = vld [vmem:[%s1311_s1 + $0x18] sm:$0xff]  ;;  %v152_v32 = vld [vmem:[%s1312_s2 + $0x30] sm:$0xff] }
  0x15   :  { %283 = vperm.xlu0 %855, %v999_v10   ;;  %v149_v27 = vld [vmem:[%s1312_s2 + $0x18] sm:$0xff]  ;;  %v1083_v29 = vld [vmem:[%s1311_s1 + $0x8] sm:$0xff]  ;;  %v150_v38 = vld [vmem:[%s1312_s2 + $0x20] sm:$0xff] }
  0x16   :  { %v147_v30 = vld [vmem:[%s1312_s2 + $0x8] sm:$0xff]  ;;  %v29_v50 = vld [vmem:[%s1310_s0] sm:$0x7] }
  0x17   :  { %v1141_v53 = vrot.slane %v29_v50, %v324_v47  ;;  %v1145_v54 = vrot.slane %v29_v50, %v128_v48  ;;  %v1147_v56 = vrot.slane %v29_v50, %v424_v52 }
  0x18   :  { %857 = vset.pattern.permute.xlu1 %v919_v4 }
  0x19   :  { %108 = vperm.xlu1 %857, %v42_v5   ;;  %275 = vperm.xlu0 %855, %v1006_v12  }
  0x1d   :  { %858 = vset.pattern.permute.xlu1 %v918_v3  ;;  %267 = vperm.xlu0 %855, %v1013_v13  }
  0x1e   :  { %311 = vperm.xlu1 %858, %v43_v14  }
  0x21   :  { %886 = vset.pattern.permute.xlu0 %v919_v4 }
  0x22   :  { %859 = vset.pattern.permute.xlu1 %v920_v11  ;;  %123 = vperm.xlu0 %886, %v45_v6  }
  0x23   :  { %415 = vperm.xlu1 %859, %v44_v2  }
  0x26   :  { %118 = vperm.xlu0 %886, %v44_v2   ;;  %v148_v2 = vld [vmem:[%s1312_s2 + $0x10] sm:$0xff] }
  0x27   :  { %860 = vset.pattern.permute.xlu1 %v919_v4 }
  0x28   :  { %224 = vperm.xlu1 %860, %v158_v15  }
  0x2a   :  { %113 = vperm.xlu0 %886, %v43_v14  }
  0x2c   :  { %861 = vset.pattern.permute.xlu1 %v920_v11 }
  0x2d   :  { %411 = vperm.xlu1 %861, %v43_v14  }
  0x2e   :  { %229 = vperm.xlu0 %886, %v159_v16  }
  0x31   :  { %862 = vset.pattern.permute.xlu1 %v919_v4 }
  0x32   :  { %98 = vperm.xlu1 %862, %v983_v7   ;;  %103 = vperm.xlu0 %886, %v41_v17  }
  0x36   :  { %863 = vset.pattern.permute.xlu1 %v918_v3  ;;  %219 = vperm.xlu0 %886, %v157_v18  }
  0x37   :  { %303 = vperm.xlu1 %863, %v41_v17  }
  0x3a   :  { %93 = vperm.xlu0 %886, %v39_v19  }
  0x3b   :  { %864 = vset.pattern.permute.xlu1 %v920_v11 }
  0x3c   :  { %407 = vperm.xlu1 %864, %v42_v5  }
  0x3e   :  { %209 = vperm.xlu0 %886, %v155_v20  }
  0x40   :  { %865 = vset.pattern.permute.xlu1 %v919_v4 }
  0x41   :  { %214 = vperm.xlu1 %865, %v156_v21  }
  0x42   :  { %83 = vperm.xlu0 %886, %v37_v22  }
  0x45   :  { %866 = vset.pattern.permute.xlu1 %v920_v11 }
  0x46   :  { %403 = vperm.xlu1 %866, %v41_v17   ;;  %199 = vperm.xlu0 %886, %v153_v23   ;;  %v30_v23 = vld [vmem:[%s1311_s1] sm:$0xff] }
  0x4a   :  { %867 = vset.pattern.permute.xlu1 %v919_v4  ;;  %73 = vperm.xlu0 %886, %v35_v24  }
  0x4b   :  { %88 = vperm.xlu1 %867, %v993_v9  }
  0x4e   :  { %189 = vperm.xlu0 %886, %v151_v25  }
  0x4f   :  { %868 = vset.pattern.permute.xlu1 %v918_v3 }
  0x50   :  { %295 = vperm.xlu1 %868, %v39_v19  }
  0x52   :  { %63 = vperm.xlu0 %886, %v1069_v26  }
  0x54   :  { %869 = vset.pattern.permute.xlu1 %v920_v11 }
  0x55   :  { %399 = vperm.xlu1 %869, %v983_v7  }
  0x56   :  { %179 = vperm.xlu0 %886, %v149_v27  }
  0x59   :  { %870 = vset.pattern.permute.xlu1 %v919_v4 }
  0x5a   :  { %204 = vperm.xlu1 %870, %v154_v28   ;;  %53 = vperm.xlu0 %886, %v1083_v29  }
  0x5e   :  { %871 = vset.pattern.permute.xlu1 %v920_v11  ;;  %169 = vperm.xlu0 %886, %v147_v30  }
  0x5f   :  { %395 = vperm.xlu1 %871, %v39_v19  }
  0x62   :  { %164 = vperm.xlu0 %886, %v146_v31  }
  0x63   :  { %872 = vset.pattern.permute.xlu1 %v919_v4 }
  0x64   :  { %78 = vperm.xlu1 %872, %v999_v10  }
  0x66   :  { %892 = vset.pattern.permute.xlu0 %v920_v11 }
  0x67   :  { %363 = vperm.xlu0 %892, %v1083_v29  }
  0x68   :  { %873 = vset.pattern.permute.xlu1 %v918_v3 }
  0x69   :  { %287 = vperm.xlu1 %873, %v37_v22  }
  0x6b   :  { %895 = vset.pattern.permute.xlu0 %v919_v4 }
  0x6d   :  { %874 = vset.pattern.permute.xlu1 %v920_v11 }
  0x6e   :  { %391 = vperm.xlu1 %874, %v993_v9  }
  0x72   :  { %875 = vset.pattern.permute.xlu1 %v919_v4 }
  0x73   :  { %194 = vperm.xlu1 %875, %v152_v32  }
  0x77   :  { %876 = vset.pattern.permute.xlu1 %v920_v11 }
  0x78   :  { %387 = vperm.xlu1 %876, %v37_v22  }
  0x7c   :  { %877 = vset.pattern.permute.xlu1 %v919_v4 }
  0x7d   :  { %68 = vperm.xlu1 %877, %v1006_v12  }
  0x80   :  { %v240_v33 = vpop.permute.xlu1 %239  ;;  %v316_v34 = vpop.permute.xlu0 %315 }
  0x81   :  { %878 = vset.pattern.permute.xlu1 %v918_v3  ;;  %v340_v62 = vmul.f32 %v1141_v53, %v316_v34 }
  0x82   :  { %279 = vperm.xlu1 %878, %v35_v24  }
  0x84   :  { %v1110_v35 = vpop.permute.xlu0 %307 }
  0x85   :  { %v320_v36 = vpop.permute.xlu1 %319  ;;  %v338_v30 = vmul.f32 %v1141_v53, %v1110_v35 }
  0x86   :  { %879 = vset.pattern.permute.xlu1 %v920_v11  ;;  %v341_v59 = vmul.f32 %v1141_v53, %v320_v36 }
  0x87   :  { %383 = vperm.xlu1 %879, %v999_v10  }
  0x88   :  { %v1114_v37 = vpop.permute.xlu0 %299 }
  0x8a   :  { %v235_v39 = vpop.permute.xlu1 %234 }
  0x8b   :  { %880 = vset.pattern.permute.xlu1 %v919_v4 }
  0x8c   :  { %184 = vperm.xlu1 %880, %v150_v38   ;;  %v1120_v40 = vpop.permute.xlu0 %291 }
  0x8f   :  { %v420_v41 = vpop.permute.xlu1 %419 }
  0x90   :  { %881 = vset.pattern.permute.xlu1 %v920_v11  ;;  %v1123_v43 = vpop.permute.xlu0 %283  ;;  %v441_v63 = vmul.f32 %v1147_v56, %v420_v41 }
  0x91   :  { %379 = vperm.xlu1 %881, %v35_v24  }
  0x94   :  { %v109_v45 = vpop.permute.xlu1 %108  ;;  %v1127_v46 = vpop.permute.xlu0 %275 }
  0x95   :  { %882 = vset.pattern.permute.xlu1 %v919_v4  ;;  %v142_v28 = vmul.f32 %v1145_v54, %v109_v45 }
  0x96   :  { %58 = vperm.xlu1 %882, %v1013_v13  }
  0x98   :  { %v1133_v49 = vpop.permute.xlu0 %267 }
  0x99   :  { %v312_v51 = vpop.permute.xlu1 %311 }
  0x9a   :  { %883 = vset.pattern.permute.xlu1 %v918_v3  ;;  %v339_v18 = vmul.f32 %v1141_v53, %v312_v51 }
  0x9b   :  { %271 = vperm.xlu1 %883, %v1069_v26  }
  0x9d   :  { %v124_v55 = vpop.permute.xlu0 %123 }
  0x9e   :  { %v145_v57 = vmul.f32 %v1145_v54, %v124_v55  ;;  %v416_v58 = vpop.permute.xlu1 %415 }
  0x9f   :  { %884 = vset.pattern.permute.xlu1 %v920_v11  ;;  %v440_v10 = vmul.f32 %v1147_v56, %v416_v58 }
  0xa0   :  { %v257_v60 = vadd.f32 %v240_v33, %v145_v57  ;;  %375 = vperm.xlu1 %884, %v1006_v12   ;;  %v478_v57 = vld [vmem:[%s1313_s3 + $0x20] sm:$0xff] }
  0xa1   :  { %v119_v61 = vpop.permute.xlu0 %118  ;;  %810 = vmatprep.mubr.f32.mxu1 %v478_v57 }
  0xa2   :  { %v357_v0 = vadd.f32 %v341_v59, %v257_v60  ;;  %v144_v1 = vmul.f32 %v1145_v54, %v119_v61  ;;  %v482_v59 = vld [vmem:[%s1314_s4] sm:$0xff]  ;;  %v483_v60 = vld [vmem:[%s1314_s4 + $0x8] sm:$0xff]  ;;  %v336_v61 = vmul.f32 %v1141_v53, %v1114_v37  ;;  %v485_v37 = vld [vmem:[%s1314_s4 + $0x18] sm:$0xff] }
  0xa3   :  { %v225_v5 = vpop.permute.xlu1 %224  ;;  %497 = vperm.xlu0 %895, %v483_v60  }
  0xa4   :  { %v457_v6 = vadd.f32 %v441_v63, %v357_v0  ;;  %v256_v7 = vadd.f32 %v235_v39, %v144_v1  ;;  %885 = vset.pattern.permute.xlu1 %v919_v4  ;;  %v254_v31 = vadd.f32 %v225_v5, %v142_v28  ;;  %v643_v0 = vld [vmem:[%s1315_s5] sm:$0xff]  ;;  %v489_v28 = vld [vmem:[%s1314_s4 + $0x38] sm:$0xff] }
  0xa5   :  { %v114_v8 = vpop.permute.xlu0 %113  ;;  %174 = vperm.xlu1 %885, %v148_v2  }
  0xa6   :  { %v473_v9 = vmax.f32 %v457_v6, 0.0  ;;  %v356_v12 = vadd.f32 %v340_v62, %v256_v7  ;;  %v143_v14 = vmul.f32 %v1145_v54, %v114_v8  ;;  %v354_v34 = vadd.f32 %v338_v30, %v254_v31  ;;  %v486_v6 = vld [vmem:[%s1314_s4 + $0x20] sm:$0xff] }
  0xa7   :  { %653 = vperm.xlu0 %895, %v643_v0   ;;  %v647_v31 = vld [vmem:[%s1315_s5 + $0x20] sm:$0xff] }
  0xa8   :  { %v456_v15 = vadd.f32 %v440_v10, %v356_v12  ;;  %v412_v16 = vpop.permute.xlu1 %411  ;;  %772 = vmatprep.subr.mxu0 %v473_v9  ;;  %816 = vmatprep.subr.mxu1 %v473_v9 }
  0xa9   :  { %v230_v17 = vpop.permute.xlu0 %229  ;;  %887 = vset.pattern.permute.xlu1 %v920_v11  ;;  %773 = vmatpush3.msra.mxu0 %v473_v9  ;;  %v439_v21 = vmul.f32 %v1147_v56, %v412_v16 }
  0xaa   :  { %v472_v19 = vmax.f32 %v456_v15, 0.0  ;;  %v255_v20 = vadd.f32 %v230_v17, %v143_v14  ;;  %832 = vmatpush3.msra.mxu1 %v473_v9  ;;  %371 = vperm.xlu1 %887, %v1069_v26   ;;  %v644_v14 = vld [vmem:[%s1315_s5 + $0x8] sm:$0xff] }
  0xab   :  { %512 = vperm.xlu0 %895, %v486_v6   ;;  %v487_v15 = vld [vmem:[%s1314_s4 + $0x28] sm:$0xff] }
  0xac   :  { %v355_v22 = vadd.f32 %v339_v18, %v255_v20  ;;  %774 = vmatprep.subr.mxu0 %v472_v19  ;;  %817 = vmatprep.subr.mxu1 %v472_v19  ;;  %v488_v20 = vld [vmem:[%s1314_s4 + $0x30] sm:$0xff] }
  0xad   :  { %v99_v24 = vpop.permute.xlu1 %98  ;;  %775 = vmatpush3.msra.mxu0 %v472_v19  ;;  %833 = vmatpush3.msra.mxu1 %v472_v19  ;;  %v104_v32 = vpop.permute.xlu0 %103  ;;  %v645_v19 = vld [vmem:[%s1315_s5 + $0x10] sm:$0xff] }
  0xae   :  { %v455_v25 = vadd.f32 %v439_v21, %v355_v22  ;;  %888 = vset.pattern.permute.xlu1 %v919_v4  ;;  %v141_v38 = vmul.f32 %v1145_v54, %v104_v32  ;;  %v649_v32 = vld [vmem:[%s1315_s5 + $0x30] sm:$0xff] }
  0xaf   :  { %48 = vperm.xlu1 %888, %v30_v23   ;;  %517 = vperm.xlu0 %895, %v487_v15  }
  0xb0   :  { %v471_v27 = vmax.f32 %v455_v25, 0.0 }
  0xb1   :  { %v220_v41 = vpop.permute.xlu0 %219 }
  0xb2   :  { %v304_v26 = vpop.permute.xlu1 %303  ;;  %776 = vmatprep.subr.mxu0 %v471_v27  ;;  %818 = vmatprep.subr.mxu1 %v471_v27 }
  0xb3   :  { %889 = vset.pattern.permute.xlu1 %v918_v3  ;;  %777 = vmatpush3.msra.mxu0 %v471_v27  ;;  %v337_v35 = vmul.f32 %v1141_v53, %v304_v26 }
  0xb4   :  { %834 = vmatpush3.msra.mxu1 %v471_v27  ;;  %263 = vperm.xlu1 %889, %v1083_v29   ;;  %v253_v29 = vadd.f32 %v220_v41, %v141_v38  ;;  %v646_v27 = vld [vmem:[%s1315_s5 + $0x18] sm:$0xff]  ;;  %v721_v38 = vld [vmem:[#allocation2] sm:$0x1] }
  0xb5   :  { %v94_v63 = vpop.permute.xlu0 %93  ;;  %522 = vperm.xlu0 %895, %v488_v20  }
  0xb6   :  { %v353_v50 = vadd.f32 %v337_v35, %v253_v29  ;;  %v139_v7 = vmul.f32 %v1145_v54, %v94_v63 }
  0xb7   :  { %v408_v33 = vpop.permute.xlu1 %407 }
  0xb8   :  { %v438_v36 = vmul.f32 %v1147_v56, %v408_v33  ;;  %890 = vset.pattern.permute.xlu1 %v920_v11  ;;  %v334_v33 = vmul.f32 %v1141_v53, %v1120_v40  ;;  %v650_v40 = vld [vmem:[%s1315_s5 + $0x38] sm:$0xff] }
  0xb9   :  { %367 = vperm.xlu1 %890, %v1013_v13   ;;  %v210_v9 = vpop.permute.xlu0 %209  ;;  %527 = vperm.xlu0 %895, %v489_v28  }
  0xba   :  { %v454_v39 = vadd.f32 %v438_v36, %v354_v34  ;;  %v251_v17 = vadd.f32 %v210_v9, %v139_v7  ;;  %v648_v36 = vld [vmem:[%s1315_s5 + $0x28] sm:$0xff] }
  0xbc   :  { %v470_v42 = vmax.f32 %v454_v39, 0.0  ;;  %v215_v45 = vpop.permute.xlu1 %214 }
  0xbd   :  { %891 = vset.pattern.permute.xlu1 %v918_v3  ;;  %v474_v3 = vld [vmem:[%s1313_s3] sm:$0xff]  ;;  %683 = vperm.xlu0 %895, %v649_v32   ;;  %v84_v39 = vpop.permute.xlu0 %83 }
  0xbe   :  { %259 = vperm.xlu1 %891, %v30_v23   ;;  %778 = vmatprep.subr.mxu0 %v470_v42  ;;  %v137_v35 = vmul.f32 %v1145_v54, %v84_v39 }
  0xbf   :  { %819 = vmatprep.subr.mxu1 %v470_v42  ;;  %779 = vmatpush3.msra.mxu0 %v470_v42 }
  0xc0   :  { %835 = vmatpush3.msra.mxu1 %v470_v42  ;;  %804 = vmatprep.mubr.f32.mxu0 %v474_v3 }
  0xc1   :  { %v404_v47 = vpop.permute.xlu1 %403  ;;  %724 = vperm.xlu0 %895, %v721_v38  }
  0xc2   :  { %v437_v13 = vmul.f32 %v1147_v56, %v404_v47  ;;  %893 = vset.pattern.permute.xlu1 %v920_v11  ;;  %v140_v11 = vmul.f32 %v1145_v54, %v99_v24 }
  0xc3   :  { %359 = vperm.xlu1 %893, %v30_v23  }
  0xc4   :  { %v453_v51 = vadd.f32 %v437_v13, %v353_v50  ;;  %v252_v62 = vadd.f32 %v215_v45, %v140_v11  ;;  %v200_v13 = vpop.permute.xlu0 %199 }
  0xc6   :  { %v469_v52 = vmax.f32 %v453_v51, 0.0  ;;  %v1183_v55 = vpop.permute.xlu1 %88  ;;  %v352_v2 = vadd.f32 %v336_v61, %v252_v62  ;;  %v249_v51 = vadd.f32 %v200_v13, %v137_v35 }
  0xc7   :  { %894 = vset.pattern.permute.xlu1 %v919_v4  ;;  %v484_v4 = vld [vmem:[%s1314_s4 + $0x10] sm:$0xff]  ;;  %v138_v26 = vmul.f32 %v1145_v54, %v1183_v55 }
  0xc8   :  { %780 = vmatprep.subr.mxu0 %v469_v52  ;;  %820 = vmatprep.subr.mxu1 %v469_v52 }
  0xc9   :  { %781 = vmatpush3.msra.mxu0 %v469_v52  ;;  %836 = vmatpush3.msra.mxu1 %v469_v52 }
  0xca   :  { %492 = vperm.xlu1 %894, %v482_v59  }
  0xcb   :  { %v296_v58 = vpop.permute.xlu1 %295 }
  0xcc   :  { %v335_v16 = vmul.f32 %v1141_v53, %v296_v58 }
  0xce   :  { %502 = vperm.xlu1 %894, %v484_v4   ;;  %v351_v21 = vadd.f32 %v335_v16, %v251_v17  ;;  %v332_v4 = vmul.f32 %v1141_v53, %v1123_v43 }
  0xd0   :  { %v400_v1 = vpop.permute.xlu1 %399 }
  0xd1   :  { %v436_v5 = vmul.f32 %v1147_v56, %v400_v1 }
  0xd2   :  { %507 = vperm.xlu1 %894, %v485_v37  }
  0xd3   :  { %v452_v8 = vadd.f32 %v436_v5, %v352_v2  ;;  %v74_v2 = vpop.permute.xlu0 %73 }
  0xd4   :  { %v135_v37 = vmul.f32 %v1145_v54, %v74_v2 }
  0xd5   :  { %v468_v10 = vmax.f32 %v452_v8, 0.0  ;;  %v205_v12 = vpop.permute.xlu1 %204 }
  0xd6   :  { %658 = vperm.xlu1 %894, %v644_v14   ;;  %v250_v34 = vadd.f32 %v205_v12, %v138_v26 }
  0xd7   :  { %782 = vmatprep.subr.mxu0 %v468_v10  ;;  %821 = vmatprep.subr.mxu1 %v468_v10  ;;  %v190_v9 = vpop.permute.xlu0 %189 }
  0xd8   :  { %783 = vmatpush3.msra.mxu0 %v468_v10  ;;  %837 = vmatpush3.msra.mxu1 %v468_v10  ;;  %v350_v42 = vadd.f32 %v334_v33, %v250_v34  ;;  %v247_v10 = vadd.f32 %v190_v9, %v135_v37  ;;  %v477_v9 = vld [vmem:[%s1313_s3 + $0x18] sm:$0xff] }
  0xda   :  { %v396_v18 = vpop.permute.xlu1 %395  ;;  %663 = vperm.xlu1 %894, %v645_v19  }
  0xdb   :  { %v435_v22 = vmul.f32 %v1147_v56, %v396_v18  ;;  %v64_v18 = vpop.permute.xlu0 %63 }
  0xdc   :  { %v133_v26 = vmul.f32 %v1145_v54, %v64_v18 }
  0xdd   :  { %v451_v23 = vadd.f32 %v435_v22, %v351_v21  ;;  %v330_v22 = vmul.f32 %v1141_v53, %v1127_v46 }
  0xde   :  { %668 = vperm.xlu1 %894, %v646_v27  }
  0xdf   :  { %v467_v24 = vmax.f32 %v451_v23, 0.0  ;;  %v79_v25 = vpop.permute.xlu1 %78  ;;  %v180_v23 = vpop.permute.xlu0 %179 }
  0xe0   :  { %v136_v60 = vmul.f32 %v1145_v54, %v79_v25  ;;  %v245_v34 = vadd.f32 %v180_v23, %v133_v26 }
  0xe1   :  { %784 = vmatprep.subr.mxu0 %v467_v24  ;;  %822 = vmatprep.subr.mxu1 %v467_v24 }
  0xe2   :  { %785 = vmatpush3.msra.mxu0 %v467_v24  ;;  %838 = vmatpush3.msra.mxu1 %v467_v24 }
  0xe3   :  { %673 = vperm.xlu1 %894, %v647_v31  }
  0xe4   :  { %v288_v30 = vpop.permute.xlu1 %287 }
  0xe5   :  { %v333_v52 = vmul.f32 %v1141_v53, %v288_v30  ;;  %v54_v30 = vpop.permute.xlu0 %53 }
  0xe7   :  { %678 = vperm.xlu1 %894, %v648_v36   ;;  %v349_v3 = vadd.f32 %v333_v52, %v249_v51 }
  0xe9   :  { %v392_v41 = vpop.permute.xlu1 %391  ;;  %v170_v46 = vpop.permute.xlu0 %169 }
  0xea   :  { %v434_v45 = vmul.f32 %v1147_v56, %v392_v41 }
  0xeb   :  { %688 = vperm.xlu1 %894, %v650_v40  }
  0xec   :  { %v450_v29 = vadd.f32 %v434_v45, %v350_v42 }
  0xed   :  { %v165_v35 = vpop.permute.xlu0 %164 }
  0xee   :  { %v466_v47 = vmax.f32 %v450_v29, 0.0  ;;  %v195_v50 = vpop.permute.xlu1 %194  ;;  %v131_v29 = vmul.f32 %v1145_v54, %v54_v30 }
  0xef   :  { %v248_v62 = vadd.f32 %v195_v50, %v136_v60 }
  0xf0   :  { %786 = vmatprep.subr.mxu0 %v466_v47  ;;  %823 = vmatprep.subr.mxu1 %v466_v47  ;;  %v243_v51 = vadd.f32 %v170_v46, %v131_v29 }
  0xf1   :  { %787 = vmatpush3.msra.mxu0 %v466_v47  ;;  %839 = vmatpush3.msra.mxu1 %v466_v47  ;;  %v348_v0 = vadd.f32 %v332_v4, %v248_v62  ;;  %v364_v13 = vpop.permute.xlu0 %363 }
  0xf3   :  { %v388_v55 = vpop.permute.xlu1 %387 }
  0xf4   :  { %v433_v57 = vmul.f32 %v1147_v56, %v388_v55  ;;  %v328_v55 = vmul.f32 %v1141_v53, %v1133_v49 }
  0xf6   :  { %v449_v11 = vadd.f32 %v433_v57, %v349_v3  ;;  %v427_v57 = vmul.f32 %v1147_v56, %v364_v13 }
  0xf8   :  { %v465_v58 = vmax.f32 %v449_v11, 0.0  ;;  %v69_v59 = vpop.permute.xlu1 %68 }
  0xf9   :  { %v134_v19 = vmul.f32 %v1145_v54, %v69_v59 }
  0xfa   :  { %788 = vmatprep.subr.mxu0 %v465_v58  ;;  %824 = vmatprep.subr.mxu1 %v465_v58 }
  0xfb   :  { %789 = vmatpush3.msra.mxu0 %v465_v58  ;;  %840 = vmatpush3.msra.mxu1 %v465_v58 }
  0xfd   :  { %v280_v61 = vpop.permute.xlu1 %279 }
  0xfe   :  { %v331_v8 = vmul.f32 %v1141_v53, %v280_v61 }
 0x100   :  { %v347_v43 = vadd.f32 %v331_v8, %v247_v10  ;;  %v476_v8 = vld [vmem:[%s1313_s3 + $0x10] sm:$0xff]  ;;  %v481_v10 = vld [vmem:[%s1313_s3 + $0x38] sm:$0xff] }
 0x102   :  { %v384_v63 = vpop.permute.xlu1 %383 }
 0x103   :  { %v432_v1 = vmul.f32 %v1147_v56, %v384_v63 }
 0x105   :  { %v448_v5 = vadd.f32 %v432_v1, %v348_v0 }
 0x107   :  { %v464_v6 = vmax.f32 %v448_v5, 0.0  ;;  %v185_v7 = vpop.permute.xlu1 %184 }
 0x108   :  { %v246_v21 = vadd.f32 %v185_v7, %v134_v19  ;;  %v475_v7 = vld [vmem:[%s1313_s3 + $0x8] sm:$0xff] }
 0x109   :  { %790 = vmatprep.subr.mxu0 %v464_v6  ;;  %825 = vmatprep.subr.mxu1 %v464_v6 }
 0x10a   :  { %791 = vmatpush3.msra.mxu0 %v464_v6  ;;  %841 = vmatpush3.msra.mxu1 %v464_v6  ;;  %v346_v25 = vadd.f32 %v330_v22, %v246_v21 }
 0x10c   :  { %v380_v12 = vpop.permute.xlu1 %379 }
 0x10d   :  { %v431_v14 = vmul.f32 %v1147_v56, %v380_v12 }
 0x10f   :  { %v447_v15 = vadd.f32 %v431_v14, %v347_v43 }
 0x111   :  { %v463_v16 = vmax.f32 %v447_v15, 0.0  ;;  %v59_v17 = vpop.permute.xlu1 %58 }
 0x112   :  { %v132_v40 = vmul.f32 %v1145_v54, %v59_v17 }
 0x113   :  { %792 = vmatprep.subr.mxu0 %v463_v16  ;;  %826 = vmatprep.subr.mxu1 %v463_v16 }
 0x114   :  { %793 = vmatpush3.msra.mxu0 %v463_v16  ;;  %842 = vmatpush3.msra.mxu1 %v463_v16 }
 0x116   :  { %v272_v20 = vpop.permute.xlu1 %271 }
 0x117   :  { %v329_v33 = vmul.f32 %v1141_v53, %v272_v20 }
 0x119   :  { %v345_v38 = vadd.f32 %v329_v33, %v245_v34 }
 0x11b   :  { %v376_v24 = vpop.permute.xlu1 %375 }
 0x11c   :  { %v430_v27 = vmul.f32 %v1147_v56, %v376_v24 }
 0x11e   :  { %v446_v28 = vadd.f32 %v430_v27, %v346_v25  ;;  %v498_v14 = vpop.permute.xlu0 %497 }
 0x120   :  { %v462_v31 = vmax.f32 %v446_v28, 0.0  ;;  %v175_v32 = vpop.permute.xlu1 %174 }
 0x121   :  { %v244_v52 = vadd.f32 %v175_v32, %v132_v40 }
 0x122   :  { %794 = vmatprep.subr.mxu0 %v462_v31  ;;  %827 = vmatprep.subr.mxu1 %v462_v31  ;;  %v654_v16 = vpop.permute.xlu0 %653 }
 0x123   :  { %795 = vmatpush3.msra.mxu0 %v462_v31  ;;  %843 = vmatpush3.msra.mxu1 %v462_v31  ;;  %v344_v58 = vadd.f32 %v328_v55, %v244_v52 }
 0x125   :  { %v372_v36 = vpop.permute.xlu1 %371 }
 0x126   :  { %v429_v39 = vmul.f32 %v1147_v56, %v372_v36  ;;  %v513_v18 = vpop.permute.xlu0 %512 }
 0x128   :  { %v445_v41 = vadd.f32 %v429_v39, %v345_v38 }
 0x12a   :  { %v461_v42 = vmax.f32 %v445_v41, 0.0  ;;  %v49_v45 = vpop.permute.xlu1 %48  ;;  %v518_v20 = vpop.permute.xlu0 %517 }
 0x12b   :  { %v130_v62 = vmul.f32 %v1145_v54, %v49_v45 }
 0x12c   :  { %796 = vmatprep.subr.mxu0 %v461_v42  ;;  %828 = vmatprep.subr.mxu1 %v461_v42 }
 0x12d   :  { %797 = vmatpush3.msra.mxu0 %v461_v42  ;;  %844 = vmatpush3.msra.mxu1 %v461_v42  ;;  %v242_v49 = vadd.f32 %v165_v35, %v130_v62 }
 0x12f   :  { %v264_v47 = vpop.permute.xlu1 %263 }
 0x130   :  { %v327_v50 = vmul.f32 %v1141_v53, %v264_v47  ;;  %v523_v32 = vpop.permute.xlu0 %522 }
 0x132   :  { %v343_v3 = vadd.f32 %v327_v50, %v243_v51 }
 0x134   :  { %v368_v11 = vpop.permute.xlu1 %367  ;;  %v443_v60 = vadd.f32 %v427_v57, %v343_v3  ;;  %v528_v51 = vpop.permute.xlu0 %527 }
 0x135   :  { %v428_v59 = vmul.f32 %v1147_v56, %v368_v11 }
 0x136   :  { %v459_v0 = vmax.f32 %v443_v60, 0.0 }
 0x137   :  { %v444_v61 = vadd.f32 %v428_v59, %v344_v58 }
 0x139   :  { %v460_v4 = vmax.f32 %v444_v61, 0.0  ;;  %v260_v63 = vpop.permute.xlu1 %259 }
 0x13a   :  { %v326_v1 = vmul.f32 %v1141_v53, %v260_v63  ;;  %v479_v53 = vld [vmem:[%s1313_s3 + $0x28] sm:$0xff] }
 0x13b   :  { %798 = vmatprep.subr.mxu0 %v460_v4  ;;  %829 = vmatprep.subr.mxu1 %v460_v4 }
 0x13c   :  { %799 = vmatpush3.msra.mxu0 %v460_v4  ;;  %845 = vmatpush3.msra.mxu1 %v460_v4  ;;  %v342_v5 = vadd.f32 %v326_v1, %v242_v49  ;;  %v684_v49 = vpop.permute.xlu0 %683 }
 0x13d   :  { %800 = vmatprep.subr.mxu0 %v459_v0  ;;  %830 = vmatprep.subr.mxu1 %v459_v0 }
 0x13e   :  { %v360_v2 = vpop.permute.xlu1 %359  ;;  %801 = vmatpush3.msra.mxu0 %v459_v0  ;;  %846 = vmatpush3.msra.mxu1 %v459_v0 }
 0x13f   :  { %v426_v37 = vmul.f32 %v1147_v56, %v360_v2  ;;  %v480_v56 = vld [vmem:[%s1313_s3 + $0x30] sm:$0xff]  ;;  %s921_s3 = smov [#allocation3]  }
 0x140   :  { %s740_s12 = sshll.u32 %s921_s3, 4  ;;  %s741_s12 = int_to_ptr.vmem [resolvable:$true] %s740_s12 }
 0x141   :  { %v442_v6 = vadd.f32 %v426_v37, %v342_v5  ;;  %s896_s13 = scalar_lea.vmem %s741_s12, 16  ;;  %s900_s14 = scalar_lea.vmem %s741_s12, 32 }
 0x142   :  { %p897_p0 = scmp.ne.s32.totalorder %s741_s12, %s896_s13  ;;  %p901_p1 = scmp.lt.s32.totalorder %s741_s12, %s741_s12 }
 0x143   :  { %v458_v54 = vmax.f32 %v442_v6, 0.0  ;;  %p902_p2 = scmp.lt.s32.totalorder %s900_s14, %s896_s13 }
 0x145   :  { %802 = vmatprep.subr.mxu0 %v458_v54  ;;  %831 = vmatprep.subr.mxu1 %v458_v54  ;;  %v493_v12 = vpop.permute.xlu1 %492  ;;  %p903_p3 = por %p902_p2, %p901_p1 }
 0x146   :  { %803 = vmatpush3.msra.mxu0 %v458_v54  ;;  %847 = vmatpush3.msra.mxu1 %v458_v54 }
 0x147   :  { %805 = vmatmul.mubr.f32.vlgmr.msra.gmra.mxu0 %v475_v7  ;;  %811 = vmatmul.mubr.f32.vlgmr.msra.gmra.mxu1 %v479_v53  ;;  %p904_p4 = pnand %p903_p3, %p897_p0 }
 0x148   :  { %807 = vmatprep.mubr.f32.mxu0 %v476_v8  ;;  %813 = vmatprep.mubr.f32.mxu1 %v480_v56 }
 0x149   :  { %v503_v43 = vpop.permute.xlu1 %502 }
 0x14b   :  { %808 = vmatmul.mubr.f32.gmra.mxu0 %v477_v9  ;;  %814 = vmatmul.mubr.f32.gmra.mxu1 %v481_v10 }
 0x14d   :  { %v508_v15 = vpop.permute.xlu1 %507 }
 0x151   :  { %v659_v17 = vpop.permute.xlu1 %658 }
 0x155   :  { %v664_v19 = vpop.permute.xlu1 %663 }
 0x159   :  { %v669_v23 = vpop.permute.xlu1 %668 }
 0x15e   :  { %v674_v38 = vpop.permute.xlu1 %673 }
 0x162   :  { %v679_v58 = vpop.permute.xlu1 %678 }
 0x166   :  { %v689_v6 = vpop.permute.xlu1 %688 }
 0x207   :  { %v806_v21 = vpop.f32.mrf.mxu0  ;;  %v812_v22 = vpop.f32.mrf.mxu1 }
 0x208   :  { %v602_v24 = vadd.f32 %v806_v21, %v498_v14  ;;  %v622_v39 = vadd.f32 %v812_v22, %v518_v20 }
 0x209   :  { %v596_v25 = vpop.f32.mrf.mxu0  ;;  %v616_v27 = vpop.f32.mrf.mxu1 }
 0x20a   :  { %v597_v28 = vadd.f32 %v596_v25, %v493_v12  ;;  %v636_v26 = vmax.f32 %v602_v24, 0.0  ;;  %v617_v34 = vadd.f32 %v616_v27, %v513_v18  ;;  %v640_v52 = vmax.f32 %v622_v39, 0.0 }
 0x20b   :  { %v809_v30 = vpop.f32.mrf.mxu0  ;;  %v815_v31 = vpop.f32.mrf.mxu1 }
 0x20c   :  { %v635_v33 = vmax.f32 %v597_v28, 0.0  ;;  %v612_v36 = vadd.f32 %v809_v30, %v508_v15  ;;  %v692_v45 = vmul.f32 %v659_v17, %v636_v26  ;;  %v639_v47 = vmax.f32 %v617_v34, 0.0  ;;  %v725_v17 = vpop.permute.xlu0 %724 }
 0x20d   :  { %v606_v46 = vpop.f32.mrf.mxu0  ;;  %v626_v42 = vpop.f32.mrf.mxu1  ;;  %v632_v57 = vadd.f32 %v815_v31, %v528_v51  ;;  %v696_v63 = vmul.f32 %v679_v58, %v640_v52 }
 0x20e   :  { %v691_v41 = vmul.f32 %v654_v16, %v635_v33  ;;  %v638_v35 = vmax.f32 %v612_v36, 0.0  ;;  %v607_v29 = vadd.f32 %v606_v46, %v503_v43  ;;  %v627_v13 = vadd.f32 %v626_v42, %v523_v32 }
 0x20f   :  { %v701_v55 = vsel %vm699_vm0, %v692_v45, 0.0  ;;  %v695_v60 = vmul.f32 %v674_v38, %v639_v47  ;;  %v642_v1 = vmax.f32 %v632_v57, 0.0  ;;  %v709_v7 = vsel %vm699_vm0, %v696_v63, 0.0 }
 0x210   :  { %v700_v40 = vsel %vm699_vm0, %v691_v41, 0.0  ;;  %v637_v50 = vmax.f32 %v607_v29, 0.0  ;;  %v694_v3 = vmul.f32 %v669_v23, %v638_v35  ;;  %v641_v62 = vmax.f32 %v627_v13, 0.0 }
 0x211   :  { %v702_v59 = vadd.f32 %v701_v55, %v700_v40  ;;  %v707_v5 = vsel %vm699_vm0, %v695_v60, 0.0  ;;  %v698_v53 = vmul.f32 %v689_v6, %v642_v1 }
 0x212   :  { %v693_v11 = vmul.f32 %v664_v19, %v637_v50  ;;  %v705_v0 = vsel %vm699_vm0, %v694_v3, 0.0  ;;  %v697_v37 = vmul.f32 %v684_v49, %v641_v62  ;;  %v730_v19 = vrot.slane %v725_v17, %v128_v48 }
 0x213   :  { %v713_v10 = vsel %vm699_vm0, %v698_v53, 0.0 }
 0x214   :  { %v703_v61 = vsel %vm699_vm0, %v693_v11, 0.0  ;;  %v711_v56 = vsel %vm699_vm0, %v697_v37, 0.0 }
 0x215   :  { %v704_v4 = vadd.f32 %v703_v61, %v702_v59 }
 0x217   :  { %v706_v2 = vadd.f32 %v705_v0, %v704_v4 }
 0x219   :  { %v708_v54 = vadd.f32 %v707_v5, %v706_v2 }
 0x21b   :  { %v710_v8 = vadd.f32 %v709_v7, %v708_v54 }
 0x21d   :  { %v712_v9 = vadd.f32 %v711_v56, %v710_v8 }
 0x21f   :  { %v714_v12 = vadd.f32 %v713_v10, %v712_v9 }
 0x221   :  { %v715_v43 = vrot.slane %v714_v12, 4 }
 0x223   :  { %v716_v14 = vadd.f32 %v715_v43, %v714_v12 }
 0x225   :  { %v717_v15 = vrot.slane %v716_v14, 2 }
 0x227   :  { %v718_v16 = vadd.f32 %v717_v15, %v716_v14 }
 0x229   :  { %v719_v18 = vrot.slane %v718_v16, 1 }
 0x22b   :  { %v720_v20 = vadd.f32 %v719_v18, %v718_v16 }
 0x22d   :  { %v731_v21 = vadd.f32 %v730_v19, %v720_v20 }
 0x22f   :  { %733 = vst.msk [vmem:[#allocation3] sm:$0x1] %vm732_vm1, %v731_v21 }
 0x230   :  { %907 = shalt.err (!%p904_p4)
}
 0x231   :  { %743 = dma.vmem_to_hbm [thread:$0]  %s741_s12, 16, %s1317_s7, [#allocation4]  }
 0x232   :  { %916 = dma.done.wait [#allocation4], 16  }
 0x233   :  { %917 = vsyncadd [#allocation4], 4294967280 }
 0x234   :  { %747 = vsyncpa [#allocation4], 1 }

</bundles_post_ra>
